<compile_context>
chip_gen: v7x
topology: tpu7x:2x2x1
jax: 0.10.0
libtpu: 0.0.40
codegen_flags: <defaults>
</compile_context>

<pallas_src>
import functools
import math

import jax
import jax.numpy as jnp
from jax.experimental import pallas as pl
from jax.experimental.pallas import tpu as pltpu


# ----------------------------------------------------------------------------
# Kernels
# ----------------------------------------------------------------------------
def _lane_tile_pe(pe, reps):
    # (ts, D) -> (ts, reps*D): lane-axis tiling of the pe block so it lines up
    # with x laid out as (seq, batch*d_model).  Pure VMEM vreg copies.
    if reps == 1:
        return pe
    return jnp.concatenate([pe] * reps, axis=1)


def _te_eval_kernel(x_ref, pe_ref, o_ref, *, reps):
    pe = _lane_tile_pe(pe_ref[...], reps)
    o_ref[...] = (x_ref[...] + pe).astype(o_ref.dtype)


def _te_train_kernel(x_ref, pe_ref, bits_ref, o_ref, *, reps, threshold, scale):
    pe = _lane_tile_pe(pe_ref[...], reps)
    y = x_ref[...] + pe
    # Inverted dropout: keep iff bits >= threshold  (keep prob = 1 - p).
    keep = bits_ref[...] >= jnp.uint32(threshold)
    scale = jnp.asarray(scale, y.dtype)
    o_ref[...] = jnp.where(keep, y * scale, jnp.zeros_like(y)).astype(o_ref.dtype)


# ----------------------------------------------------------------------------
# Helpers
# ----------------------------------------------------------------------------
def _dropout_threshold(p):
    # drop iff bits < threshold  => P(drop) = p
    return min(int(round(p * float(2 ** 32))), 2 ** 32 - 1)


def _pick_seq_tile(S, row_bytes, target_bytes=1 << 20):
    """Seq-tile length: ~target_bytes per x block, multiple of 8 (or full S)."""
    if S <= 8:
        return S
    ts = max(1, target_bytes // max(1, row_bytes))
    ts = max(8, min(ts, S))
    return (ts // 8) * 8


# ----------------------------------------------------------------------------
# Module-equivalent wrapper
# ----------------------------------------------------------------------------
class TemporalEncoding:
    """JAX/Pallas equivalent of the PyTorch TemporalEncoding module."""

    def __init__(self, d_model: int, dropout: float = 0.1, max_len: int = 5000):
        self.p = float(dropout)
        self.d_model = int(d_model)
        position = jnp.arange(max_len, dtype=jnp.float32)[:, None]           # (L, 1)
        div_term = jnp.exp(
            jnp.arange(0, d_model, 2, dtype=jnp.float32)
            * (-math.log(10000.0) / d_model)
        )                                                                      # (D/2,)
        pe2d = jnp.zeros((max_len, d_model), dtype=jnp.float32)
        pe2d = pe2d.at[:, 0::2].set(jnp.sin(position * div_term))
        pe2d = pe2d.at[:, 1::2].set(jnp.cos(position * div_term))
        self.pe = pe2d[:, None, :]          # (L, 1, D) -- matches the torch buffer
        self._pe2d = pe2d                   # (L, D)    -- what the kernel streams
        self._pe_cache = {jnp.dtype(jnp.float32): pe2d}

    def _pe_for_dtype(self, dtype):
        key = jnp.dtype(dtype)
        if key not in self._pe_cache:
            self._pe_cache[key] = self._pe2d.astype(key)   # cached, not per call
        return self._pe_cache[key]

    def __call__(self, x, *, training: bool = False, seed: int = 0):
        S, B, D = x.shape
        assert D == self.d_model
        dtype = x.dtype
        pe = self._pe_for_dtype(dtype)                     # (max_len, D), x's dtype

        BD = B * D
        x2 = x.reshape(S, BD)                              # free contiguous reshape
        itemsize = jnp.dtype(dtype).itemsize
        ts = _pick_seq_tile(S, BD * itemsize)
        grid = (pl.cdiv(S, ts),)

        # pe blocks are (ts, D); if ts is not a multiple of 8 (only when S < 8)
        # slice pe so the block equals the full leading dim (BlockSpec rule).
        pe_in = pe if ts % 8 == 0 else pe[:S]

        x_spec = pl.BlockSpec((ts, BD), lambda i: (i, 0))
        pe_spec = pl.BlockSpec((ts, D), lambda i: (i, 0))
        o_spec = pl.BlockSpec((ts, BD), lambda i: (i, 0))
        out_shape = jax.ShapeDtypeStruct((S, BD), dtype)

        compiler_params = pltpu.CompilerParams(
            dimension_semantics=("parallel",),     # seq tiles shard across TCs (v7x)
            vmem_limit_bytes=32 * 1024 * 1024,     # explicit budget, safe on v5e/v6e/v7x
        )

        if (not training) or self.p == 0.0:
            out2 = pl.pallas_call(
                functools.partial(_te_eval_kernel, reps=B),
                out_shape=out_shape,
                grid_spec=pltpu.PrefetchScalarGridSpec(
                    num_scalar_prefetch=0,
                    grid=grid,
                    in_specs=[x_spec, pe_spec],
                    out_specs=o_spec,
                ),
                compiler_params=compiler_params,
            )(x2, pe_in)
        else:
            # TODO(synk): PRNG stream differs from torch's; the mask distribution
            # and inverted-dropout scaling match, the exact bits do not.
            threshold = _dropout_threshold(self.p)
            scale = 1.0 / (1.0 - self.p)
            bits = jax.random.bits(jax.random.PRNGKey(seed), (S, BD), dtype=jnp.uint32)
            bits_spec = pl.BlockSpec((ts, BD), lambda i: (i, 0))
            out2 = pl.pallas_call(
                functools.partial(
                    _te_train_kernel, reps=B, threshold=threshold, scale=scale
                ),
                out_shape=out_shape,
                grid_spec=pltpu.PrefetchScalarGridSpec(
                    num_scalar_prefetch=0,
                    grid=grid,
                    in_specs=[x_spec, pe_spec, bits_spec],
                    out_specs=o_spec,
                ),
                compiler_params=compiler_params,
            )(x2, pe_in, bits)

        return out2.reshape(S, B, D)


# ----------------------------------------------------------------------------
# Demo / correctness check
# ----------------------------------------------------------------------------
if __name__ == "__main__":
    seq_len, batch, d_model = 8, 2, 32
    key = jax.random.PRNGKey(0)
    x = jax.random.normal(key, (seq_len, batch, d_model), dtype=jnp.float32)

    mod = TemporalEncoding(d_model=d_model, dropout=0.1, max_len=5000)

    # ---- eval path (dropout = identity, matches nn.Dropout.eval()) ----
    out = jax.block_until_ready(mod(x, training=False))
    ref = x + mod.pe[:seq_len]
    assert out.shape == (seq_len, batch, d_model)
    assert jnp.allclose(out, ref, atol=1e-6, rtol=1e-6), "eval path mismatch"

    # ---- training path (inverted dropout with integer-threshold mask) ----
    seed = 123
    out_tr = jax.block_until_ready(mod(x, training=True, seed=seed))
    bits = jax.random.bits(
        jax.random.PRNGKey(seed), (seq_len, batch * d_model), dtype=jnp.uint32
    ).reshape(seq_len, batch, d_model)
    keep = bits >= jnp.uint32(_dropout_threshold(mod.p))
    ref_tr = jnp.where(keep, ref * jnp.float32(1.0 / (1.0 - mod.p)), 0.0)
    assert out_tr.shape == (seq_len, batch, d_model)
    assert jnp.allclose(out_tr, ref_tr, atol=1e-5, rtol=1e-5), "train path mismatch"

    print("KERNEL_OK")
</pallas_src>

<mosaic_0001>
module attributes {stable_mosaic.version = 11 : i64} {
  func.func @_te_eval_kernel(%arg0: i32, %arg1: memref<8x64xf32, #tpu.memory_space<vmem>>, %arg2: memref<8x32xf32, #tpu.memory_space<vmem>>, %arg3: memref<8x64xf32, #tpu.memory_space<vmem>>) attributes {dimension_semantics = [#tpu.dimension_semantics<parallel>], iteration_bounds = array<i64: 1>, scalar_prefetch = 0 : i64, scratch_operands = 0 : i64, tpu.core_type = #tpu.core_type<tc>, window_params = [{transform_indices = @transform_0, window_bounds = array<i64: 8, 64>}, {transform_indices = @transform_1, window_bounds = array<i64: 8, 32>}, {transform_indices = @transform_2, window_bounds = array<i64: 8, 64>}]} {
    %c0 = arith.constant 0 : index
    %c0_0 = arith.constant 0 : index
    %0 = vector.load %arg2[%c0, %c0_0] : memref<8x32xf32, #tpu.memory_space<vmem>>, vector<8x32xf32>
    %1 = tpu.concatenate %0, %0 in 1 : vector<8x32xf32>, vector<8x32xf32> -> vector<8x64xf32>
    %c0_1 = arith.constant 0 : index
    %c0_2 = arith.constant 0 : index
    %2 = vector.load %arg1[%c0_1, %c0_2] : memref<8x64xf32, #tpu.memory_space<vmem>>, vector<8x64xf32>
    %3 = arith.addf %2, %1 : vector<8x64xf32>
    %c0_3 = arith.constant 0 : index
    %c0_4 = arith.constant 0 : index
    %4 = vector.load %arg3[%c0_3, %c0_4] : memref<8x64xf32, #tpu.memory_space<vmem>>, vector<8x64xf32>
    tpu.vector_store %arg3[%c0_3, %c0_4], %3 {strides = array<i32>} : memref<8x64xf32, #tpu.memory_space<vmem>>, vector<8x64xf32>,
    return
  }
  func.func @transform_0(%arg0: i32) -> (i32, i32) {
    %c0_i32 = arith.constant 0 : i32
    %c0_i32_0 = arith.constant 0 : i32
    return %arg0, %c0_i32 : i32, i32
  }
  func.func @transform_1(%arg0: i32) -> (i32, i32) {
    %c0_i32 = arith.constant 0 : i32
    %c0_i32_0 = arith.constant 0 : i32
    return %arg0, %c0_i32 : i32, i32
  }
  func.func @transform_2(%arg0: i32) -> (i32, i32) {
    %c0_i32 = arith.constant 0 : i32
    %c0_i32_0 = arith.constant 0 : i32
    return %arg0, %c0_i32 : i32, i32
  }
}

</mosaic_0001>

<bundles_post_ra>
// kernel: tpu_custom_call.1
= control target key start
LH: loop header
LB: loop body
LE: loop exit
PB: predicated region body
PF: predicated region fallthrough
CT: control target
= control target key end

     0   :  { %s98_s0 = inlined_call_operand.vmem [shape: f32[8,64], index: 0, kind: input, shape index: {}]   ;;  %s99_s1 = inlined_call_operand.vmem [shape: f32[5000,32], index: 1, kind: input, shape index: {}]   ;;  %s100_s2 = inlined_call_operand.hbm [shape: f32[8,64], index: 2, kind: output, shape index: {}]  }
   0x1   :  { %v12_v0 = vld [vmem:[%s99_s1] sm:$0xff] }
   0x2   :  { %7 = vsyncpa [#allocation3], 0  ;;  %s63_s11 = smov 32   ;;  %vm17_vm0 = vcmask 261120   ;;  %v19_v1 = vld [vmem:[%s98_s0] sm:$0xff]  ;;  %s64_s14 = smov [#allocation2]  }
   0x3   :  { %14 = vrot.lane.b32.xlu0 %v12_v0, %s63_s11  ;;  %s29_s15 = sshll.u32 %s64_s14, 4  ;;  %vm21_vm1 = vcmask 523264   ;;  %s30_s15 = int_to_ptr.vmem [resolvable:$true] %s29_s15 }
   0x4   :  { %s39_s16 = scalar_lea.vmem %s30_s15, 128  ;;  %p44_p1 = scmp.lt.s32.totalorder %s30_s15, %s30_s15 }
   0x5   :  { %p40_p0 = scmp.ne.s32.totalorder %s30_s15, %s39_s16  ;;  %p45_p2 = scmp.lt.s32.totalorder %s39_s16, %s39_s16 }
   0x7   :  { %p46_p3 = por %p45_p2, %p44_p1 }
   0x9   :  { %p47_p4 = pnand %p46_p3, %p40_p0 }
  0x75   :  { %v15_v2 = vpop.permute.xlu0 %14 }
  0x76   :  { %v18_v3 = vsel %vm17_vm0, %v12_v0, %v15_v2 }
  0x77   :  { %v20_v4 = vadd.f32 %v19_v1, %v18_v3 }
  0x79   :  { %22 = vst.msk [vmem:[#allocation2] sm:$0xff] %vm21_vm1, %v20_v4 }
  0x7a   :  { %50 = shalt.err (!%p47_p4)
}
  0x7b   :  { %s51_s18 = scalar_lea.hbm %s100_s2, 128 }
  0x7c   :  { %p52_p5 = scmp.ne.s32.totalorder %s100_s2, %s51_s18  ;;  %p55_p6 = scmp.lt.u32.totalorder %s51_s18, %s100_s2 }
  0x7e   :  { %p57_p7 = pnand %p55_p6, %p52_p5 }
  0x80   :  { %60 = shalt.err (!%p57_p7)
}
  0x81   :  { %32 = dma.vmem_to_hbm [thread:$0]  %s30_s15, 128, %s100_s2, [#allocation3]  }
  0x82   :  { %61 = dma.done.wait [#allocation3], 128  }
  0x83   :  { %62 = vsyncadd [#allocation3], 4294967168 }
  0x84   :  { %36 = vsyncpa [#allocation3], 1 }

</bundles_post_ra>
